<compile_context>
chip_gen: v5e
topology: v5e:2x2
jax: 0.10.0
libtpu: 0.0.40
codegen_flags: <defaults>
</compile_context>

<pallas_src>
import jax
import jax.numpy as jnp
from jax.experimental import pallas as pl
from jax.experimental.pallas import tpu as pltpu


def _round_up(x, m):
    return ((x + m - 1) // m) * m


def mf_kernel(u_ref, a_ref, o_ref):
    # u_ref, a_ref: (F_pad, TB) f32 ; o_ref: (1, TB) f32
    # Fused multiply + sublane reduction; bias already folded into the feature axis.
    o_ref[...] = jnp.sum(u_ref[...] * a_ref[...], axis=0, keepdims=True)


def mf_forward(params, user_ids, anime_ids, *, tile_b=1024):
    """Matrix-factorization forward. user_ids/anime_ids: (B,) int -> (B,) f32."""
    B = user_ids.shape[0]
    num_users, F = params["user_emb"].shape
    num_anime = params["anime_emb"].shape[0]

    Fe = F + 2                      # features + user_bias slot + anime_bias slot
    F_pad = _round_up(Fe, 8)        # full sublane groups

    # Lane-aligned batch tile: multiple of 128, no larger than the (padded) batch.
    tb = min(tile_b, _round_up(B, 128))
    tb = _round_up(tb, 128)
    Bp = _round_up(B, tb)
    n_steps = Bp // tb

    # Pad ids with 0 (always a valid row); padded lanes are computed then dropped.
    pad = Bp - B
    uid = jnp.pad(user_ids.astype(jnp.int32), (0, pad))
    aid = jnp.pad(anime_ids.astype(jnp.int32), (0, pad))

    # Fold biases into the (small) tables once; zero-pad features to F_pad.
    #   dot(user_full[u], anime_full[a]) =
    #       sum(u_emb * a_emb) + user_bias[u] * 1 + 1 * anime_bias[a]
    zpad_u = jnp.zeros((num_users, F_pad - Fe), jnp.float32)
    zpad_a = jnp.zeros((num_anime, F_pad - Fe), jnp.float32)
    user_full = jnp.concatenate(
        [params["user_emb"], params["user_bias"],
         jnp.ones((num_users, 1), jnp.float32), zpad_u], axis=1)      # (U, F_pad)
    anime_full = jnp.concatenate(
        [params["anime_emb"], jnp.ones((num_anime, 1), jnp.float32),
         params["anime_bias"], zpad_a], axis=1)                        # (A, F_pad)

    # Glue: row gathers (plain XLA), transposed so batch is the lane axis.
    u = jnp.take(user_full, uid, axis=0).T    # (F_pad, Bp)
    a = jnp.take(anime_full, aid, axis=0).T   # (F_pad, Bp)

    out = pl.pallas_call(
        mf_kernel,
        out_shape=jax.ShapeDtypeStruct((1, Bp), jnp.float32),
        grid=(n_steps,),
        in_specs=[
            pl.BlockSpec((F_pad, tb), lambda i: (0, i)),
            pl.BlockSpec((F_pad, tb), lambda i: (0, i)),
        ],
        out_specs=pl.BlockSpec((1, tb), lambda i: (0, i)),
        compiler_params=pltpu.CompilerParams(
            dimension_semantics=("parallel",),
            # 2 inputs x 2 buffers x F_pad*tb*4B is tiny for F_pad=40, tb<=2048;
            # stated explicitly for headroom on v5e/v7x.
            vmem_limit_bytes=64 * 1024 * 1024,
        ),
    )(u, a)
    return out[0, :B]  # (B,), matches torch .squeeze() result


def init_params(key, num_users, num_anime, num_factors):
    k_u, k_a = jax.random.split(key)
    return {
        # nn.init.normal_(std=0.01)
        "user_emb": 0.01 * jax.random.normal(k_u, (num_users, num_factors), jnp.float32),
        "anime_emb": 0.01 * jax.random.normal(k_a, (num_anime, num_factors), jnp.float32),
        # nn.init.zeros_
        "user_bias": jnp.zeros((num_users, 1), jnp.float32),
        "anime_bias": jnp.zeros((num_anime, 1), jnp.float32),
    }


def reference_forward(params, user_ids, anime_ids):
    u = params["user_emb"][user_ids]
    a = params["anime_emb"][anime_ids]
    ub = params["user_bias"][user_ids][:, 0]
    ab = params["anime_bias"][anime_ids][:, 0]
    return (u * a).sum(axis=1) + ub + ab


if __name__ == "__main__":
    num_users, num_anime, num_factors = 50, 60, 32
    batch = 16

    key = jax.random.PRNGKey(0)
    k_params, k_uid, k_aid = jax.random.split(key, 3)
    params = init_params(k_params, num_users, num_anime, num_factors)

    # Make biases non-trivial so the bias-folding path is actually exercised.
    k_ub, k_ab = jax.random.split(k_params)
    params["user_bias"] = 0.05 * jax.random.normal(k_ub, (num_users, 1), jnp.float32)
    params["anime_bias"] = 0.05 * jax.random.normal(k_ab, (num_anime, 1), jnp.float32)

    user_ids = jax.random.randint(k_uid, (batch,), 0, num_users, dtype=jnp.int32)
    anime_ids = jax.random.randint(k_aid, (batch,), 0, num_anime, dtype=jnp.int32)

    out = mf_forward(params, user_ids, anime_ids)
    out = jax.block_until_ready(out)

    ref = reference_forward(params, user_ids, anime_ids)
    assert out.shape == (batch,)
    assert jnp.allclose(out, ref, atol=1e-6, rtol=1e-6)

    # Also exercise a batch that is NOT a multiple of the tile (padding path)
    # and a multi-step grid (tile_b=128, batch=21 -> Bp=128 ... and 149 -> 2 steps).
    uid2 = jnp.concatenate([user_ids, user_ids[:5]])
    aid2 = jnp.concatenate([anime_ids, anime_ids[:5]])
    out2 = jax.block_until_ready(mf_forward(params, uid2, aid2, tile_b=128))
    assert jnp.allclose(out2, reference_forward(params, uid2, aid2), atol=1e-6, rtol=1e-6)

    uid3 = jnp.tile(user_ids, 10)[:149]
    aid3 = jnp.tile(anime_ids, 10)[:149]
    out3 = jax.block_until_ready(mf_forward(params, uid3, aid3, tile_b=128))
    assert jnp.allclose(out3, reference_forward(params, uid3, aid3), atol=1e-6, rtol=1e-6)

    print("KERNEL_OK")
</pallas_src>

<mosaic_0001>
module attributes {stable_mosaic.version = 11 : i64} {
  func.func @mf_kernel(%arg0: i32, %arg1: memref<40x128xf32, #tpu.memory_space<vmem>>, %arg2: memref<40x128xf32, #tpu.memory_space<vmem>>, %arg3: memref<1x128xf32, #tpu.memory_space<vmem>>) attributes {dimension_semantics = [#tpu.dimension_semantics<parallel>], iteration_bounds = array<i64: 1>, scalar_prefetch = 0 : i64, scratch_operands = 0 : i64, tpu.core_type = #tpu.core_type<tc>, window_params = [{transform_indices = @transform_0, window_bounds = array<i64: 40, 128>}, {transform_indices = @transform_1, window_bounds = array<i64: 40, 128>}, {transform_indices = @transform_2, window_bounds = array<i64: 1, 128>}]} {
    %c0 = arith.constant 0 : index
    %c0_0 = arith.constant 0 : index
    %0 = vector.load %arg1[%c0, %c0_0] : memref<40x128xf32, #tpu.memory_space<vmem>>, vector<40x128xf32>
    %c0_1 = arith.constant 0 : index
    %c0_2 = arith.constant 0 : index
    %1 = vector.load %arg2[%c0_1, %c0_2] : memref<40x128xf32, #tpu.memory_space<vmem>>, vector<40x128xf32>
    %2 = arith.mulf %0, %1 : vector<40x128xf32>
    %cst = arith.constant dense<0.000000e+00> : vector<128xf32>
    %3 = vector.multi_reduction <add>, %2, %cst [0] : vector<40x128xf32> to vector<128xf32>
    %4 = vector.shape_cast %3 : vector<128xf32> to vector<1x128xf32>
    %c0_3 = arith.constant 0 : index
    %c0_4 = arith.constant 0 : index
    %5 = vector.load %arg3[%c0_3, %c0_4] : memref<1x128xf32, #tpu.memory_space<vmem>>, vector<1x128xf32>
    tpu.vector_store %arg3[%c0_3, %c0_4], %4 {strides = array<i32>} : memref<1x128xf32, #tpu.memory_space<vmem>>, vector<1x128xf32>,
    return
  }
  func.func @transform_0(%arg0: i32) -> (i32, i32) {
    %c0_i32 = arith.constant 0 : i32
    %c0_i32_0 = arith.constant 0 : i32
    return %c0_i32, %arg0 : i32, i32
  }
  func.func @transform_1(%arg0: i32) -> (i32, i32) {
    %c0_i32 = arith.constant 0 : i32
    %c0_i32_0 = arith.constant 0 : i32
    return %c0_i32, %arg0 : i32, i32
  }
  func.func @transform_2(%arg0: i32) -> (i32, i32) {
    %c0_i32 = arith.constant 0 : i32
    %c0_i32_0 = arith.constant 0 : i32
    return %c0_i32, %arg0 : i32, i32
  }
}

</mosaic_0001>

<bundles_post_ra>
// kernel: tpu_custom_call.1
= control target key start
LH: loop header
LB: loop body
LE: loop exit
PB: predicated region body
PF: predicated region fallthrough
CT: control target
= control target key end

     0   :  { %7 = vsyncpa [#allocation3], 0  ;;  %s200_s0 = inlined_call_operand.hbm [shape: f32[40,128], index: 0, kind: input, shape index: {}]   ;;  %s201_s1 = inlined_call_operand.hbm [shape: f32[40,128], index: 1, kind: input, shape index: {}]   ;;  %s202_s2 = inlined_call_operand.hbm [shape: f32[1,128], index: 2, kind: output, shape index: {}]  }
   0x1   :  { %8 = vsyncpa [#allocation6], 0 }
   0x2   :  { %9 = vsyncpa [#allocation4], 0  ;;  %s14_s11 = sshll.u32 %s200_s0, 4  ;;  %s171_s12 = smov [#allocation2]   ;;  %s15_s11 = int_to_ptr.hbm [resolvable:$true] %s14_s11 }
   0x3   :  { %s16_s13 = sshll.u32 %s171_s12, 4  ;;  %s27_s16 = sshll.u32 %s201_s1, 4  ;;  %s17_s13 = int_to_ptr.vmem [resolvable:$true] %s16_s13  ;;  %s28_s16 = int_to_ptr.hbm [resolvable:$true] %s27_s16 }
   0x4   :  { %s172_s17 = smov 128   ;;  %s173_s18 = smov 8  }
   0x5   :  { %22 = dma.hbm_to_vmem [thread:$0]  %s15_s11, 640, %s17_s13, [#allocation3], %s172_s17, %s172_s17, %s173_s18  }
   0x6   :  { %s174_s19 = smov [#allocation5]  }
   0x7   :  { %s29_s20 = sshll.u32 %s174_s19, 4  ;;  %s30_s20 = int_to_ptr.vmem [resolvable:$true] %s29_s20 }
   0x8   :  { %35 = dma.hbm_to_vmem [thread:$0]  %s28_s16, 640, %s30_s20, [#allocation6], %s172_s17, %s172_s17, %s173_s18  }
   0x9   :  { %165 = dma.done.wait [#allocation3], 640  }
   0xa   :  { %166 = vsyncadd [#allocation3], 4294966656 }
   0xb   :  { %167 = dma.done.wait [#allocation6], 640  }
   0xc   :  { %168 = vsyncadd [#allocation6], 4294966656  ;;  %v44_v0 = vld [vmem:[#allocation2] sm:$0xff]  ;;  %v45_v1 = vld [vmem:[#allocation2 + $0x8] sm:$0xff]  ;;  %s175_s0 = smov [#allocation7]   ;;  %s77_s23 = sshll.u32 %s202_s2, 4  ;;  %s78_s23 = int_to_ptr.hbm [resolvable:$true] %s77_s23 }
   0xd   :  { %v46_v2 = vld [vmem:[#allocation2 + $0x10] sm:$0xff]  ;;  %v47_v3 = vld [vmem:[#allocation2 + $0x18] sm:$0xff]  ;;  %v49_v4 = vld [vmem:[#allocation5] sm:$0xff]  ;;  %s75_s1 = sshll.u32 %s175_s0, 4  ;;  %s76_s1 = int_to_ptr.vmem [resolvable:$true] %s75_s1 }
   0xe   :  { %v50_v5 = vld [vmem:[#allocation5 + $0x8] sm:$0xff]  ;;  %v51_v6 = vld [vmem:[#allocation5 + $0x10] sm:$0xff]  ;;  %v52_v7 = vld [vmem:[#allocation5 + $0x18] sm:$0xff]  ;;  %v54_v8 = vmul.f32 %v49_v4, %v44_v0 }
   0xf   :  { %v55_v9 = vmul.f32 %v50_v5, %v45_v1  ;;  %v56_v10 = vmul.f32 %v51_v6, %v46_v2  ;;  %v48_v11 = vld [vmem:[#allocation2 + $0x20] sm:$0xff]  ;;  %v53_v12 = vld [vmem:[#allocation5 + $0x20] sm:$0xff]  ;;  %v57_v13 = vmul.f32 %v52_v7, %v47_v3 }
  0x10   :  { %v58_v15 = vmul.f32 %v53_v12, %v48_v11 }
  0x11   :  { %v59_v14 = vadd.f32 %v55_v9, %v54_v8 }
  0x13   :  { %v60_v16 = vadd.f32 %v59_v14, %v56_v10 }
  0x15   :  { %v61_v17 = vadd.f32 %v60_v16, %v57_v13 }
  0x17   :  { %v62_v18 = vadd.f32 %v61_v17, %v58_v15 }
  0x19   :  { %v63_v19 = vrot.slane %v62_v18, 4 }
  0x1b   :  { %v64_v20 = vadd.f32 %v63_v19, %v62_v18 }
  0x1d   :  { %v65_v21 = vrot.slane %v64_v20, 2 }
  0x1f   :  { %v66_v22 = vadd.f32 %v65_v21, %v64_v20 }
  0x21   :  { %v67_v23 = vrot.slane %v66_v22, 1 }
  0x23   :  { %v68_v24 = vadd.f32 %v67_v23, %v66_v22 }
  0x25   :  { %69 = vst [vmem:[#allocation7] sm:$0x1] %v68_v24 }
  0x26   :  { %80 = dma.vmem_to_hbm [thread:$0]  %s76_s1, 16, %s78_s23, [#allocation4]  }
  0x27   :  { %169 = dma.done.wait [#allocation4], 16  }
  0x28   :  { %170 = vsyncadd [#allocation4], 4294967280 }
  0x29   :  { %85 = vsyncpa [#allocation3], 1 }
  0x2a   :  { %86 = vsyncpa [#allocation6], 1 }
  0x2b   :  { %87 = vsyncpa [#allocation4], 1 }

</bundles_post_ra>
